<compile_context>
chip_gen: v6e
topology: v6e:2x2x1
jax: 0.10.0
libtpu: 0.0.40
codegen_flags: <defaults>
</compile_context>

<pallas_src>
import jax
import jax.numpy as jnp
from jax.experimental import pallas as pl
from jax.experimental.pallas import tpu as pltpu


def _single_conv_kernel(p_ref, w_ref, s_ref, b_ref, o_ref):
    # p_ref: (1, KKC, P)   im2col patches for one batch element (VMEM)
    # w_ref: (Cout, KKC)   flattened conv weights
    # s_ref, b_ref: (Cout, 1)  folded BatchNorm scale / bias (conv bias included)
    # o_ref: (1, Cout, P)  lane-dense output (P = Ho*Wo, multiple of 128)
    y = jnp.dot(w_ref[...], p_ref[0],
                preferred_element_type=jnp.float32)      # (Cout, P) single MXU matmul
    y = y * s_ref[...] + b_ref[...]                      # fused BN affine (lane broadcast)
    o_ref[0] = jnp.maximum(y, 0.0).astype(o_ref.dtype)   # ReLU; Dropout is identity (eval)


def single_conv_forward(x_nchw, w_oihw, conv_b, gamma, beta,
                        running_mean, running_var, eps=1e-5):
    """Conv2d(k=3, s=1, p=1, bias=True) + BatchNorm2d(eval) + ReLU + Dropout(eval).

    x_nchw : (N, Cin, H, W) float32
    w_oihw : (Cout, Cin, KH, KW)
    returns: (N, Cout, H, W)
    """
    N, Cin, H, W = x_nchw.shape
    Cout, _, KH, KW = w_oihw.shape
    Ho, Wo = H, W                      # k=3, stride=1, padding=1 -> same spatial size
    P = Ho * Wo
    KKC = KH * KW * Cin

    # ---- wrapper-side layout plumbing (plain XLA) -----------------------------------
    xf = x_nchw.astype(jnp.float32)
    x_p = jnp.pad(xf, ((0, 0), (0, 0), (1, 1), (1, 1)))          # zero pad (padding=1)
    patches = jnp.stack(
        [x_p[:, :, dy:dy + Ho, dx:dx + Wo] for dy in range(KH) for dx in range(KW)],
        axis=1)                                                  # (N, KH*KW, Cin, Ho, Wo)
    patches = patches.reshape(N, KKC, P)                         # (N, 36, 256)

    # weights as one dense 2-D slab with matching (ky, kx, cin) ordering: (Cout, KKC)
    w2 = jnp.transpose(w_oihw, (0, 2, 3, 1)).reshape(Cout, KKC).astype(jnp.float32)

    # Fold conv bias + eval-mode BatchNorm into per-channel scale / bias column vectors.
    inv_std = 1.0 / jnp.sqrt(running_var.astype(jnp.float32) + eps)
    scale = (gamma * inv_std).astype(jnp.float32)                           # (Cout,)
    bias = (beta + (conv_b - running_mean) * scale).astype(jnp.float32)     # (Cout,)
    scale = scale.reshape(Cout, 1)
    bias = bias.reshape(Cout, 1)

    out = pl.pallas_call(
        _single_conv_kernel,
        out_shape=jax.ShapeDtypeStruct((N, Cout, P), jnp.float32),
        grid_spec=pltpu.PrefetchScalarGridSpec(
            num_scalar_prefetch=0,
            grid=(N,),
            in_specs=[
                pl.BlockSpec((1, KKC, P), lambda n: (n, 0, 0)),
                pl.BlockSpec((Cout, KKC), lambda n: (0, 0)),
                pl.BlockSpec((Cout, 1), lambda n: (0, 0)),
                pl.BlockSpec((Cout, 1), lambda n: (0, 0)),
            ],
            out_specs=pl.BlockSpec((1, Cout, P), lambda n: (n, 0, 0)),
        ),
        compiler_params=pltpu.CompilerParams(
            dimension_semantics=("parallel",)),    # v7x: one batch element per TensorCore
    )(patches, w2, scale, bias)

    # (N, Cout, Ho*Wo) -> (N, Cout, Ho, Wo): contiguous metadata-only reshape, no transpose.
    return out.reshape(N, Cout, Ho, Wo)


def _reference(x_nchw, w_oihw, conv_b, gamma, beta, running_mean, running_var,
               eps=1e-5):
    y = jax.lax.conv_general_dilated(
        x_nchw, w_oihw, window_strides=(1, 1), padding=((1, 1), (1, 1)),
        dimension_numbers=("NCHW", "OIHW", "NCHW"))
    y = y + conv_b.reshape(1, -1, 1, 1)
    inv_std = 1.0 / jnp.sqrt(running_var + eps)
    y = (y - running_mean.reshape(1, -1, 1, 1)) * (gamma * inv_std).reshape(1, -1, 1, 1) \
        + beta.reshape(1, -1, 1, 1)
    return jnp.maximum(y, 0.0)   # Dropout(0.1) is identity in eval mode


if __name__ == "__main__":
    # Small shapes consistent with the module: batch=2, ch_in=4, ch_out=8, 16x16 spatial.
    N, Cin, H, W = 2, 4, 16, 16
    Cout, KH, KW = 8, 3, 3

    key = jax.random.PRNGKey(0)
    k_x, k_w, k_g, k_m, k_v = jax.random.split(key, 5)

    x = jax.random.normal(k_x, (N, Cin, H, W), jnp.float32)

    # Deterministic "kaiming-like" init: normal with std = sqrt(2 / fan_in); bias = 0.
    fan_in = Cin * KH * KW
    w = jax.random.normal(k_w, (Cout, Cin, KH, KW), jnp.float32) * jnp.sqrt(2.0 / fan_in)
    conv_b = jnp.zeros((Cout,), jnp.float32)

    # BatchNorm params: gamma ~ N(1, 0.02), beta = 0; nontrivial running stats.
    gamma = 1.0 + 0.02 * jax.random.normal(k_g, (Cout,), jnp.float32)
    beta = jnp.zeros((Cout,), jnp.float32)
    running_mean = 0.1 * jax.random.normal(k_m, (Cout,), jnp.float32)
    running_var = 1.0 + 0.1 * jax.random.uniform(k_v, (Cout,), jnp.float32)

    fn = jax.jit(single_conv_forward)
    out = fn(x, w, conv_b, gamma, beta, running_mean, running_var)
    out = jax.block_until_ready(out)

    ref = _reference(x, w, conv_b, gamma, beta, running_mean, running_var)
    assert out.shape == (N, Cout, H, W), out.shape
    assert jnp.allclose(out, ref, atol=1e-4, rtol=1e-4), float(jnp.max(jnp.abs(out - ref)))

    print("KERNEL_OK")
</pallas_src>

<mosaic_0001>
module attributes {stable_mosaic.version = 11 : i64} {
  func.func @_single_conv_kernel(%arg0: i32, %arg1: memref<1x36x256xf32, #tpu.memory_space<vmem>>, %arg2: memref<8x36xf32, #tpu.memory_space<vmem>>, %arg3: memref<8x1xf32, #tpu.memory_space<vmem>>, %arg4: memref<8x1xf32, #tpu.memory_space<vmem>>, %arg5: memref<1x8x256xf32, #tpu.memory_space<vmem>>) attributes {dimension_semantics = [#tpu.dimension_semantics<parallel>], iteration_bounds = array<i64: 2>, scalar_prefetch = 0 : i64, scratch_operands = 0 : i64, tpu.core_type = #tpu.core_type<tc>, window_params = [{transform_indices = @transform_0, window_bounds = array<i64: 1, 36, 256>}, {pipeline_mode = #tpu.pipeline_mode<synchronous>, transform_indices = @transform_1, window_bounds = array<i64: 8, 36>}, {pipeline_mode = #tpu.pipeline_mode<synchronous>, transform_indices = @transform_2, window_bounds = array<i64: 8, 1>}, {pipeline_mode = #tpu.pipeline_mode<synchronous>, transform_indices = @transform_3, window_bounds = array<i64: 8, 1>}, {transform_indices = @transform_4, window_bounds = array<i64: 1, 8, 256>}]} {
    %c0 = arith.constant 0 : index
    %c0_0 = arith.constant 0 : index
    %0 = vector.load %arg2[%c0, %c0_0] : memref<8x36xf32, #tpu.memory_space<vmem>>, vector<8x36xf32>
    %c0_1 = arith.constant 0 : index
    %c0_2 = arith.constant 0 : index
    %c0_3 = arith.constant 0 : index
    %1 = vector.load %arg1[%c0_1, %c0_2, %c0_3] : memref<1x36x256xf32, #tpu.memory_space<vmem>>, vector<1x36x256xf32>
    %2 = vector.shape_cast %1 : vector<1x36x256xf32> to vector<36x256xf32>
    %cst = arith.constant dense<0.000000e+00> : vector<8x256xf32>
    %3 = tpu.matmul %0, %2, %cst {dimension_numbers = #tpu.dot_dimension_numbers<[1], [0], [0], [1], [0, 0, 1, 1], [], []>} : vector<8x36xf32>, vector<36x256xf32>, vector<8x256xf32> -> vector<8x256xf32>
    %c0_4 = arith.constant 0 : index
    %c0_5 = arith.constant 0 : index
    %4 = vector.load %arg3[%c0_4, %c0_5] : memref<8x1xf32, #tpu.memory_space<vmem>>, vector<8x1xf32>
    %5 = vector.broadcast %4 : vector<8x1xf32> to vector<8x256xf32>
    %6 = arith.mulf %3, %5 : vector<8x256xf32>
    %c0_6 = arith.constant 0 : index
    %c0_7 = arith.constant 0 : index
    %7 = vector.load %arg4[%c0_6, %c0_7] : memref<8x1xf32, #tpu.memory_space<vmem>>, vector<8x1xf32>
    %8 = vector.broadcast %7 : vector<8x1xf32> to vector<8x256xf32>
    %9 = arith.addf %6, %8 : vector<8x256xf32>
    %cst_8 = arith.constant 0.000000e+00 : f32
    %10 = vector.broadcast %cst_8 : f32 to vector<8x256xf32>
    %11 = arith.maximumf %9, %10 : vector<8x256xf32>
    %c0_9 = arith.constant 0 : index
    %c0_10 = arith.constant 0 : index
    %c0_11 = arith.constant 0 : index
    %12 = vector.load %arg5[%c0_9, %c0_10, %c0_11] : memref<1x8x256xf32, #tpu.memory_space<vmem>>, vector<1x8x256xf32>
    %13 = vector.shape_cast %12 : vector<1x8x256xf32> to vector<8x256xf32>
    %14 = vector.shape_cast %11 : vector<8x256xf32> to vector<1x8x256xf32>
    tpu.vector_store %arg5[%c0_9, %c0_10, %c0_11], %14 {strides = array<i32>} : memref<1x8x256xf32, #tpu.memory_space<vmem>>, vector<1x8x256xf32>,
    return
  }
  func.func @transform_0(%arg0: i32) -> (i32, i32, i32) {
    %c0_i32 = arith.constant 0 : i32
    %c0_i32_0 = arith.constant 0 : i32
    %c0_i32_1 = arith.constant 0 : i32
    return %arg0, %c0_i32, %c0_i32_0 : i32, i32, i32
  }
  func.func @transform_1(%arg0: i32) -> (i32, i32) {
    %c0_i32 = arith.constant 0 : i32
    %c0_i32_0 = arith.constant 0 : i32
    %c0_i32_1 = arith.constant 0 : i32
    return %c0_i32, %c0_i32_0 : i32, i32
  }
  func.func @transform_2(%arg0: i32) -> (i32, i32) {
    %c0_i32 = arith.constant 0 : i32
    %c0_i32_0 = arith.constant 0 : i32
    %c0_i32_1 = arith.constant 0 : i32
    return %c0_i32, %c0_i32_0 : i32, i32
  }
  func.func @transform_3(%arg0: i32) -> (i32, i32) {
    %c0_i32 = arith.constant 0 : i32
    %c0_i32_0 = arith.constant 0 : i32
    %c0_i32_1 = arith.constant 0 : i32
    return %c0_i32, %c0_i32_0 : i32, i32
  }
  func.func @transform_4(%arg0: i32) -> (i32, i32, i32) {
    %c0_i32 = arith.constant 0 : i32
    %c0_i32_0 = arith.constant 0 : i32
    %c0_i32_1 = arith.constant 0 : i32
    return %arg0, %c0_i32, %c0_i32_0 : i32, i32, i32
  }
}

</mosaic_0001>

<bundles_post_ra>
// kernel: single_conv_forward.1
= control target key start
LH: loop header
LB: loop body
LE: loop exit
PB: predicated region body
PF: predicated region fallthrough
CT: control target
= control target key end

     0   :  { %s427_s15 = smov 0   ;;  %s457_s0 = inlined_call_operand.vmem [shape: f32[2,36,256], index: 0, kind: input, shape index: {}]   ;;  %s458_s1 = inlined_call_operand.vmem [shape: f32[8,36], index: 1, kind: input, shape index: {}]   ;;  %s459_s2 = inlined_call_operand.vmem [shape: f32[8,1], index: 2, kind: input, shape index: {}]   ;;  %s460_s3 = inlined_call_operand.vmem [shape: f32[8,1], index: 3, kind: input, shape index: {}]   ;;  %s461_s4 = inlined_call_operand.vmem [shape: f32[2,8,256], index: 4, kind: output, shape index: {}]  }
   0x1 LB: > { %s366_s16 = sadd.s32 4294967295, %s398_s15   ;;  %p370_p0 = scmp.ge.s32.totalorder %s398_s15, 1  ;;  %s398_s15 = sphi %s427_s15, %s14_s15  }
   0x2   : > { %p162_p1 = scmp.lt.s32.totalorder %s398_s15, 3 }
   0x4   : > { %p163_p2 = pnand %p370_p0, %p162_p1 }
   0x5   : > { %p188_p3 = scmp.lt.s32.totalorder (!%p163_p2), %s366_s16, 1 }
   0x6   : > { %166 = sbr.rel (%p163_p2) target bundleno = 228 (0xe4), region = 36 }
   0xb   : > { %v400_v0 = vmov 0.0   ;;  %v401_v1 = vmov 0   ;;  %v291_v2 = vld [vmem:[%s459_s2] sm:$0xff]  ;;  %s463_s16 = smov (!%p188_p3, %s366_s16), 1  ;;  %vm213_vm0 = vcmask 1043456   ;;  %vm209_vm1 = vcmask 293888  }
   0xc   : > { %284 = vmatprep.mubr.f32.mxu0 %v400_v0  ;;  %391 = vset.pattern.permute.xlu0 %v401_v1  ;;  %v299_v3 = vld [vmem:[%s460_s3] sm:$0xff]  ;;  %s380_s21 = smul.u32 80, %s463_s16  ;;  %s379_s27 = sshll.u32 %s463_s16, 4 }
   0xd   : > { %294 = vperm.xlu0 %391, %v291_v2   ;;  %v198_v14 = vld [vmem:[%s458_s1] sm:$0xff]  ;;  %s197_s30 = scalar_lea.vmem %s461_s4, %s379_s27 }
   0xe   : > { %s192_s24 = scalar_lea.vmem %s457_s0, %s380_s21 }
   0xf   : > { %v208_v4 = vld [vmem:[%s192_s24 + $0x48] sm:$0xf]  ;;  %v207_v5 = vld [vmem:[%s192_s24 + $0x40] sm:$0xf]  ;;  %v206_v6 = vld [vmem:[%s192_s24 + $0x38] sm:$0xff] }
  0x10   : > { %374 = vmatprep.subr.msk.mxu0 %vm213_vm0, %v208_v4  ;;  %v205_v7 = vld [vmem:[%s192_s24 + $0x30] sm:$0xff]  ;;  %v204_v8 = vld [vmem:[%s192_s24 + $0x28] sm:$0xff]  ;;  %v203_v9 = vld [vmem:[%s192_s24 + $0x20] sm:$0xff] }
  0x11   : > { %302 = vperm.xlu0 %391, %v299_v3   ;;  %375 = vmatpush1.msk.msra.mxu0 %vm213_vm0, %v207_v5  ;;  %v202_v10 = vld [vmem:[%s192_s24 + $0x18] sm:$0xff]  ;;  %v201_v11 = vld [vmem:[%s192_s24 + $0x10] sm:$0xff]  ;;  %v200_v12 = vld [vmem:[%s192_s24 + $0x8] sm:$0xff] }
  0x12   : > { %244 = vmatprep.subr.mxu0 %v206_v6  ;;  %v199_v13 = vld [vmem:[%s192_s24] sm:$0xff] }
  0x13   : > { %245 = vmatpush1.msra.mxu0 %v205_v7 }
  0x14   : > { %246 = vmatprep.subr.mxu0 %v204_v8 }
  0x15   : > { %247 = vmatpush1.msra.mxu0 %v203_v9 }
  0x16   : > { %248 = vmatprep.subr.mxu0 %v202_v10 }
  0x17   : > { %249 = vmatpush1.msra.mxu0 %v201_v11 }
  0x18   : > { %250 = vmatprep.subr.mxu0 %v200_v12 }
  0x19   : > { %251 = vmatpush1.msra.mxu0 %v199_v13 }
  0x1a   : > { %376 = vmatmul.mubr.msk.f32.vlgmr.msra.gmra.mxu0 %vm209_vm1, %v198_v14 }
  0x88   : > { %v295_v15 = vpop.permute.xlu0 %294 }
  0x8c   : > { %v303_v18 = vpop.permute.xlu0 %302 }
  0xda   : > { %v286_v16 = vpop.f32.mrf.mxu0 }
  0xdb   : > { %v297_v17 = vmul.f32 %v295_v15, %v286_v16 }
  0xdc   : > { %v288_v19 = vpop.f32.mrf.mxu0 }
  0xdd   : > { %v305_v20 = vadd.f32 %v303_v18, %v297_v17  ;;  %v298_v21 = vmul.f32 %v295_v15, %v288_v19 }
  0xdf   : > { %v307_v22 = vmax.f32 %v305_v20, 0.0  ;;  %v306_v23 = vadd.f32 %v303_v18, %v298_v21 }
  0xe1   : > { %309 = vst [vmem:[%s197_s30] sm:$0xff] %v307_v22  ;;  %v308_v24 = vmax.f32 %v306_v23, 0.0 }
  0xe3   : > { %310 = vst [vmem:[%s197_s30 + $0x8] sm:$0xff] %v308_v24 }
  0xe4 PF: > { %s14_s15 = sadd.s32 1, %s398_s15  }
  0xe5   : > { %p11_p4 = scmp.ge.s32.totalorder %s14_s15, 4  }
  0xe7   :  { %13 = sbr.rel (!%p11_p4) target bundleno = 1 (0x1), region = 66 }

</bundles_post_ra>
